<compile_context>
chip_gen: v7x
topology: tpu7x:2x2x1
jax: 0.10.0
libtpu: 0.0.40
codegen_flags: <defaults>
</compile_context>

<pallas_src>
import jax
import jax.numpy as jnp
from jax.experimental import pallas as pl
from jax.experimental.pallas import tpu as pltpu

_LANES = 128
# Minimum sublane multiple per element width (f32:8, bf16/f16:16, 8-bit:32).
_SUBLANE_ALIGN = {4: 8, 2: 16, 1: 32}


def _reexp_kernel(x_ref, o_ref):
    # Load in the streaming dtype, compute in f32, store in the output dtype.
    x = x_ref[...].astype(jnp.float32)
    y = jnp.where(x > 0, x + 1.0, jnp.exp(jnp.minimum(x, 0.0)))
    o_ref[...] = y.astype(o_ref.dtype)


def _choose_tile_rows(rows, in_itemsize, out_itemsize, *,
                      block_byte_budget=12 * 1024 * 1024,
                      min_steps=4, min_rows=256):
    """Row tile: fixed byte budget (dtype-aware), >=min_steps grid steps when
    possible (v7x has 2 TensorCores), sublane-aligned, never larger than rows."""
    align = max(_SUBLANE_ALIGN.get(in_itemsize, 8),
                _SUBLANE_ALIGN.get(out_itemsize, 8))
    bytes_per_row = _LANES * (in_itemsize + out_itemsize)
    tr_budget = max(align, (block_byte_budget // bytes_per_row) // align * align)
    # Encourage at least `min_steps` grid steps so both v7x cores get work.
    tr_split = -(-rows // min_steps)
    tr_split = -(-tr_split // align) * align
    tr = min(tr_budget, max(min_rows, tr_split))
    tr = max(align, (tr // align) * align)
    if tr >= rows:
        # Single full-extent block: block dim == array dim is always legal.
        return rows
    return tr


def _reexp_pallas_2d(x2d, out_dtype):
    rows = x2d.shape[0]
    tr = _choose_tile_rows(rows, x2d.dtype.itemsize, jnp.dtype(out_dtype).itemsize)
    grid = (pl.cdiv(rows, tr),)
    return pl.pallas_call(
        _reexp_kernel,
        out_shape=jax.ShapeDtypeStruct((rows, _LANES), out_dtype),
        grid_spec=pltpu.PrefetchScalarGridSpec(
            num_scalar_prefetch=0,
            grid=grid,
            in_specs=[pl.BlockSpec((tr, _LANES), lambda i: (i, 0))],
            out_specs=pl.BlockSpec((tr, _LANES), lambda i: (i, 0)),
        ),
        compiler_params=pltpu.CompilerParams(
            dimension_semantics=("parallel",),
            vmem_limit_bytes=48 * 1024 * 1024,
        ),
    )(x2d)


def reexp_layer(x):
    """Apply ReExp (ELU(x)+1) elementwise to an array of any shape."""
    orig_shape = x.shape
    in_dtype = x.dtype

    if jnp.issubdtype(in_dtype, jnp.floating):
        if in_dtype == jnp.dtype(jnp.float64):
            # Mosaic has no f64 path; compute and return f32.
            x = x.astype(jnp.float32)
            out_dtype = jnp.float32
        else:
            out_dtype = in_dtype
    else:
        # Integer/bool inputs: stream natively, cast in-kernel, return f32
        # (casting exp(x) back to int would silently truncate).
        out_dtype = jnp.float32

    xf = x.reshape(-1)
    n = xf.shape[0]
    n_main = (n // _LANES) * _LANES
    rows = n_main // _LANES

    if rows > 0:
        x2d = xf[:n_main].reshape(rows, _LANES)
        main_flat = _reexp_pallas_2d(x2d, out_dtype).reshape(-1)
    else:
        main_flat = jnp.zeros((0,), out_dtype)

    if n_main < n:
        # <128-element tail: tiny plain-JAX epilogue (cheaper than pad+slice).
        t = xf[n_main:].astype(jnp.float32)
        tail = jnp.where(t > 0, t + 1.0,
                         jnp.exp(jnp.minimum(t, 0.0))).astype(out_dtype)
        out_flat = jnp.concatenate([main_flat, tail]) if rows > 0 else tail
    else:
        out_flat = main_flat

    return out_flat.reshape(orig_shape)


def _ref_reexp(x):
    xf = x.astype(jnp.float32)
    return jnp.where(xf > 0, xf + 1.0, jnp.exp(xf))


if __name__ == "__main__":
    key = jax.random.PRNGKey(0)
    k1, k2, k3, k4 = jax.random.split(key, 4)

    # 1) Primary: small NCHW f32 input (128-aligned flat length).
    x = jax.random.normal(key, (2, 4, 16, 16), dtype=jnp.float32)
    y = jax.block_until_ready(reexp_layer(x))
    assert y.shape == x.shape and y.dtype == x.dtype
    assert jnp.allclose(y, _ref_reexp(x), atol=1e-6, rtol=1e-6)

    # 2) Ragged flat length (exercises aligned-prefix + tail epilogue path).
    x_odd = jax.random.normal(k1, (3, 5, 7, 11), dtype=jnp.float32)
    y_odd = jax.block_until_ready(reexp_layer(x_odd))
    assert y_odd.shape == x_odd.shape
    assert jnp.allclose(y_odd, _ref_reexp(x_odd), atol=1e-6, rtol=1e-6)

    # 3) bf16: native-width streaming, in-kernel f32 compute.
    x_bf = jax.random.normal(k2, (2, 4, 16, 16), dtype=jnp.bfloat16)
    y_bf = jax.block_until_ready(reexp_layer(x_bf))
    assert y_bf.dtype == jnp.bfloat16
    assert jnp.allclose(y_bf.astype(jnp.float32),
                        _ref_reexp(x_bf).astype(jnp.bfloat16).astype(jnp.float32),
                        atol=1e-2, rtol=1e-2)

    # 4) Multi-block grid path (rows > tile -> >=4 grid steps, parallel axis).
    x_big = jax.random.normal(k3, (4, 8, 64, 128), dtype=jnp.float32)
    y_big = jax.block_until_ready(reexp_layer(x_big))
    assert jnp.allclose(y_big, _ref_reexp(x_big), atol=1e-6, rtol=1e-6)

    # 5) int32: streamed natively, cast in-kernel, returned as float32.
    x_int = jax.random.randint(k4, (2, 4, 16, 16), -3, 4, dtype=jnp.int32)
    y_int = jax.block_until_ready(reexp_layer(x_int))
    assert y_int.dtype == jnp.float32
    assert jnp.allclose(y_int, _ref_reexp(x_int), atol=1e-6, rtol=1e-6)

    print("KERNEL_OK")
</pallas_src>

<mosaic_0001>
module attributes {stable_mosaic.version = 11 : i64} {
  func.func @_reexp_kernel(%arg0: i32, %arg1: memref<16x128xf32, #tpu.memory_space<vmem>>, %arg2: memref<16x128xf32, #tpu.memory_space<vmem>>) attributes {dimension_semantics = [#tpu.dimension_semantics<parallel>], iteration_bounds = array<i64: 1>, scalar_prefetch = 0 : i64, scratch_operands = 0 : i64, tpu.core_type = #tpu.core_type<tc>, window_params = [{transform_indices = @transform_0, window_bounds = array<i64: 16, 128>}, {transform_indices = @transform_1, window_bounds = array<i64: 16, 128>}]} {
    %c0 = arith.constant 0 : index
    %c0_0 = arith.constant 0 : index
    %0 = vector.load %arg1[%c0, %c0_0] : memref<16x128xf32, #tpu.memory_space<vmem>>, vector<16x128xf32>
    %cst = arith.constant 0.000000e+00 : f32
    %1 = vector.broadcast %cst : f32 to vector<16x128xf32>
    %2 = arith.cmpf ogt, %0, %1 : vector<16x128xf32>
    %cst_1 = arith.constant 1.000000e+00 : f32
    %3 = vector.broadcast %cst_1 : f32 to vector<16x128xf32>
    %4 = arith.addf %0, %3 : vector<16x128xf32>
    %cst_2 = arith.constant 0.000000e+00 : f32
    %5 = vector.broadcast %cst_2 : f32 to vector<16x128xf32>
    %6 = arith.minimumf %0, %5 : vector<16x128xf32>
    %7 = math.exp %6 : vector<16x128xf32>
    %8 = arith.select %2, %4, %7 : vector<16x128xi1>, vector<16x128xf32>
    %c0_3 = arith.constant 0 : index
    %c0_4 = arith.constant 0 : index
    %9 = vector.load %arg2[%c0_3, %c0_4] : memref<16x128xf32, #tpu.memory_space<vmem>>, vector<16x128xf32>
    tpu.vector_store %arg2[%c0_3, %c0_4], %8 {strides = array<i32>} : memref<16x128xf32, #tpu.memory_space<vmem>>, vector<16x128xf32>,
    return
  }
  func.func @transform_0(%arg0: i32) -> (i32, i32) {
    %c0_i32 = arith.constant 0 : i32
    %c0_i32_0 = arith.constant 0 : i32
    return %arg0, %c0_i32 : i32, i32
  }
  func.func @transform_1(%arg0: i32) -> (i32, i32) {
    %c0_i32 = arith.constant 0 : i32
    %c0_i32_0 = arith.constant 0 : i32
    return %arg0, %c0_i32 : i32, i32
  }
}

</mosaic_0001>

<bundles_post_ra>
// kernel: tpu_custom_call.1
= control target key start
LH: loop header
LB: loop body
LE: loop exit
PB: predicated region body
PF: predicated region fallthrough
CT: control target
= control target key end

     0   :  { %6 = vsyncpa [#allocation3], 0  ;;  %s156_s0 = inlined_call_operand.hbm [shape: f32[16,128], index: 0, kind: input, shape index: {}]   ;;  %s157_s1 = inlined_call_operand.hbm [shape: f32[16,128], index: 1, kind: output, shape index: {}]  }
   0x1   :  { %7 = vsyncpa [#allocation4], 0  ;;  %s112_s6 = smov [#allocation2]   ;;  %s64_s10 = scalar_lea.hbm %s156_s0, 256 }
   0x2   :  { %s13_s7 = sshll.u32 %s112_s6, 4  ;;  %p65_p0 = scmp.ne.s32.totalorder %s156_s0, %s64_s10  ;;  %s14_s7 = int_to_ptr.vmem [resolvable:$true] %s13_s7 }
   0x3   :  { %p68_p1 = scmp.lt.u32.totalorder %s64_s10, %s156_s0 }
   0x5   :  { %p70_p2 = pnand %p68_p1, %p65_p0 }
   0x7   :  { %73 = shalt.err (!%p70_p2)
}
   0x8   :  { %s74_s15 = scalar_lea.vmem %s14_s7, 256  ;;  %p79_p4 = scmp.lt.s32.totalorder %s14_s7, %s14_s7 }
   0x9   :  { %p75_p3 = scmp.ne.s32.totalorder %s14_s7, %s74_s15  ;;  %p80_p5 = scmp.lt.s32.totalorder %s74_s15, %s74_s15 }
   0xb   :  { %p81_p6 = por %p80_p5, %p79_p4 }
   0xd   :  { %p82_p7 = pnand %p81_p6, %p75_p3 }
   0xf   :  { %85 = shalt.err (!%p82_p7)
}
  0x10   :  { %s113_s16 = smov 128   ;;  %s114_s17 = smov 8  }
  0x11   :  { %19 = dma.hbm_to_vmem [thread:$0]  %s156_s0, 256, %s14_s7, [#allocation3], %s113_s16, %s113_s16, %s114_s17  }
  0x12   :  { %108 = dma.done.wait [#allocation3], 256  }
  0x13   :  { %109 = vsyncadd [#allocation3], 4294967040  ;;  %v23_v0 = vld [vmem:[#allocation2] sm:$0xff]  ;;  %v24_v1 = vld [vmem:[#allocation2 + $0x8] sm:$0xff]  ;;  %s115_s20 = smov [#allocation5]  }
  0x14   :  { %v29_v2 = vmin.f32 %v23_v0, 0.0  ;;  %v30_v3 = vmin.f32 %v24_v1, 0.0  ;;  %v27_v6 = vadd.f32 1.0, %v23_v0  ;;  %vm25_vm0 = vcmp.gt.f32.partialorder %v23_v0, 0.0  ;;  %s44_s21 = sshll.u32 %s115_s20, 4  ;;  %s45_s21 = int_to_ptr.vmem [resolvable:$true] %s44_s21 }
  0x15   :  { %v28_v7 = vadd.f32 1.0, %v24_v1  ;;  %vm26_vm1 = vcmp.gt.f32.partialorder %v24_v1, 0.0  ;;  %s86_s0 = scalar_lea.vmem %s45_s21, 256  ;;  %p91_p9 = scmp.lt.s32.totalorder %s45_s21, %s45_s21 }
  0x16   :  { %v31_v4 = vmul.f32 1.442695, %v29_v2  ;;  %v33_v5 = vmul.f32 1.442695, %v30_v3  ;;  %p87_p8 = scmp.ne.s32.totalorder %s45_s21, %s86_s0  ;;  %p92_p10 = scmp.lt.s32.totalorder %s86_s0, %s86_s0 }
  0x18   :  { %60 = vpow2.f32 %v31_v4  ;;  %p93_p11 = por %p92_p10, %p91_p9 }
  0x19   :  { %62 = vpow2.f32 %v33_v5 }
  0x1a   :  { %p94_p12 = pnand %p93_p11, %p87_p8 }
  0x22   :  { %v61_v8 = vpop.eup %60 }
  0x23   :  { %v63_v9 = vpop.eup %62  ;;  %v35_v10 = vsel %vm25_vm0, %v27_v6, %v61_v8 }
  0x24   :  { %37 = vst [vmem:[#allocation5] sm:$0xff] %v35_v10  ;;  %v36_v11 = vsel %vm26_vm1, %v28_v7, %v63_v9 }
  0x25   :  { %38 = vst [vmem:[#allocation5 + $0x8] sm:$0xff] %v36_v11 }
  0x26   :  { %97 = shalt.err (!%p94_p12)
}
  0x27   :  { %s98_s24 = scalar_lea.hbm %s157_s1, 256 }
  0x28   :  { %p99_p13 = scmp.ne.s32.totalorder %s157_s1, %s98_s24  ;;  %p102_p0 = scmp.lt.u32.totalorder %s98_s24, %s157_s1 }
  0x2a   :  { %p104_p1 = pnand %p102_p0, %p99_p13 }
  0x2c   :  { %107 = shalt.err (!%p104_p1)
}
  0x2d   :  { %50 = dma.vmem_to_hbm [thread:$0]  %s45_s21, 256, %s157_s1, [#allocation4], %s113_s16, %s113_s16, %s114_s17  }
  0x2e   :  { %110 = dma.done.wait [#allocation4], 256  }
  0x2f   :  { %111 = vsyncadd [#allocation4], 4294967040 }
  0x30   :  { %54 = vsyncpa [#allocation3], 1 }
  0x31   :  { %55 = vsyncpa [#allocation4], 1 }

</bundles_post_ra>
